<compile_context>
chip_gen: v6e
topology: v6e:2x2x1
jax: 0.10.0
libtpu: 0.0.40
codegen_flags: <defaults>
</compile_context>

<pallas_src>
import functools

import jax
import jax.numpy as jnp
import numpy as np
from jax.experimental import pallas as pl
from jax.experimental.pallas import tpu as pltpu

_LANES = 128
_DEFAULT_MAX_TILE_BYTES = 2 << 20  # ~2 MiB per input per pipeline buffer


def _dice_partial_kernel(pred_ref, target_ref, inter_ref, dd_ref, acc_ref,
                         *, tile_rows, rows, may_need_mask):
    # pred_ref / target_ref: (1, tile_rows, 128) VMEM tiles, native dtype.
    # inter_ref / dd_ref:    (1, 1, 8, 128) per-(split, batch) output blocks
    #                        holding the broadcast partial sums.
    # acc_ref:               (2, 8, 128) f32 scratch:
    #                        acc[0] = per-(sublane,lane) partial of p*t,
    #                        acc[1] = partial of (p-t)^2.
    sp = pl.program_id(0)
    t = pl.program_id(2)
    n_t = pl.num_programs(2)

    @pl.when(t == 0)
    def _():
        acc_ref[...] = jnp.zeros_like(acc_ref)

    # Stream native dtype from HBM; cast on the VPU (plenty of slack).
    p = pred_ref[...].astype(jnp.float32)      # (1, tile_rows, 128)
    q = target_ref[...].astype(jnp.float32)

    def accumulate(pp, qq):
        pt = pp * qq                 # 2 mul + 1 sub per element in total;
        d = pp - qq                  # denom rebuilt in the wrapper as
        dd = d * d                   # sum((p-t)^2) + 2*inter + 1.
        # Full-vreg partial accumulation: reshape regroups whole (8,128) vregs,
        # so this is pure VALU adds + unmasked stores (no per-step XLU reduce).
        acc_ref[0] += jnp.sum(pt.reshape(tile_rows // 8, 8, _LANES), axis=0)
        acc_ref[1] += jnp.sum(dd.reshape(tile_rows // 8, 8, _LANES), axis=0)

    g = sp * n_t + t                 # global spatial-tile index
    if may_need_mask:
        tile_start = g * tile_rows
        overruns = tile_start + tile_rows > rows

        @pl.when(overruns)
        def _():
            # Tail tile: rows >= `rows` hold out-of-bounds garbage (Pallas does
            # not zero them) -> select with jnp.where (garbage may be NaN/Inf).
            rid = tile_start + jax.lax.broadcasted_iota(
                jnp.int32, (1, tile_rows, _LANES), 1)
            valid = rid < rows
            accumulate(jnp.where(valid, p, 0.0), jnp.where(valid, q, 0.0))

        @pl.when(jnp.logical_not(overruns))
        def _():
            accumulate(p, q)
    else:
        accumulate(p, q)

    @pl.when(t == n_t - 1)
    def _():
        inter = jnp.sum(acc_ref[0])            # single cross-sublane+lane reduce
        ddsum = jnp.sum(acc_ref[1])
        inter_ref[...] = jnp.full(inter_ref.shape, inter, dtype=inter_ref.dtype)
        dd_ref[...] = jnp.full(dd_ref.shape, ddsum, dtype=dd_ref.dtype)


def dice_loss_2d(pred, target, *, max_tile_bytes=_DEFAULT_MAX_TILE_BYTES):
    """pred: (B, 1, H, W) [any float/int dtype], target: (B, H, W) -> scalar f32.

    Feed the narrowest upstream dtype (e.g. bf16 pred, bf16/int8 mask): the
    kernel is HBM-bound and casts to f32 on the VPU for free.
    """
    if pred.ndim == target.ndim + 1 and pred.shape[1] == 1:
        pred = jnp.squeeze(pred, axis=1)       # matches .squeeze(dim=1)
    B, H, W = pred.shape
    assert target.shape == (B, H, W)

    hw = H * W
    # Lane-dense layout: flatten (H, W) into rows of 128 lanes.  When H*W is a
    # multiple of 1024 the reshape is free (no HBM pass); otherwise pad the
    # flat tail only up to the next multiple of 1024 so rows % 8 == 0.
    padded_hw = hw if hw % (8 * _LANES) == 0 else (-(-hw // (8 * _LANES))) * (8 * _LANES)
    rows = padded_hw // _LANES                 # always a multiple of 8

    def lane_dense(x):
        x = jnp.reshape(x, (B, hw))
        if padded_hw != hw:
            x = jnp.pad(x, ((0, 0), (0, padded_hw - hw)))
        return jnp.reshape(x, (B, rows, _LANES))

    pred_ld = lane_dense(pred)                 # native dtype streams to the kernel
    target_ld = lane_dense(target)

    # Dtype-aware tile sizing: ~max_tile_bytes per input per pipeline buffer,
    # rounded to the dtype's sublane pack (8 f32 / 16 bf16 / 32 int8).
    itemsizes = (pred_ld.dtype.itemsize, target_ld.dtype.itemsize)
    pack = max(8, 32 // max(1, min(itemsizes)))
    cap_rows = max(pack, max_tile_bytes // (_LANES * max(itemsizes)))
    if rows <= cap_rows:
        tile_rows, total_tiles = rows, 1       # single spatial step, exact cover
    else:
        tile_rows = max(pack, (cap_rows // pack) * pack)
        total_tiles = pl.cdiv(rows, tile_rows)

    # v7x small/odd-batch: split the spatial reduction across both TensorCores.
    splits = 2 if (B % 2 == 1 and total_tiles >= 2) else 1
    tiles_per_split = pl.cdiv(total_tiles, splits)
    may_need_mask = splits * tiles_per_split * tile_rows != rows

    kernel = functools.partial(_dice_partial_kernel, tile_rows=tile_rows,
                               rows=rows, may_need_mask=may_need_mask)

    def in_map(sp, b, t):
        # Clamp so fully-out-of-range tiles (odd tile counts under a 2-way
        # split) re-read the last valid tile; their contribution is masked to 0.
        return (b, jnp.minimum(sp * tiles_per_split + t, total_tiles - 1), 0)

    def out_map(sp, b, t):
        return (sp, b, 0, 0)

    out_sds = jax.ShapeDtypeStruct((splits, B, 8, _LANES), jnp.float32)

    inter_blk, dd_blk = pl.pallas_call(
        kernel,
        out_shape=(out_sds, out_sds),
        grid=(splits, B, tiles_per_split),
        in_specs=[
            pl.BlockSpec((1, tile_rows, _LANES), in_map),
            pl.BlockSpec((1, tile_rows, _LANES), in_map),
        ],
        out_specs=(
            pl.BlockSpec((1, 1, 8, _LANES), out_map),
            pl.BlockSpec((1, 1, 8, _LANES), out_map),
        ),
        scratch_shapes=[pltpu.VMEM((2, 8, _LANES), jnp.float32)],
        # Working set ~8 MiB (2 inputs x 2 buffers x <=2 MiB) — under the
        # default scoped VMEM on v5e/v6e/v7x, so no vmem_limit_bytes needed.
        compiler_params=pltpu.CompilerParams(
            dimension_semantics=("parallel", "parallel", "arbitrary")),
    )(pred_ld, target_ld)

    # Tiny glue on B scalars (not a hot path).
    inter = jnp.sum(inter_blk[:, :, 0, 0], axis=0)         # (B,)
    ddsum = jnp.sum(dd_blk[:, :, 0, 0], axis=0)            # (B,)
    # p^2 + t^2 == (p - t)^2 + 2*p*t, so denom = ddsum + 2*inter + 1 (smooth=1).
    dice = 2.0 * inter / (ddsum + 2.0 * inter + 1.0)
    return jnp.clip(jnp.mean(1.0 - dice), 0.0, 1.0)


def _reference(pred, target):
    p = jnp.squeeze(pred, axis=1).astype(jnp.float32)
    t = target.astype(jnp.float32)
    inter = jnp.sum(p * t, axis=(1, 2))
    denom = jnp.sum(p * p, axis=(1, 2)) + jnp.sum(t * t, axis=(1, 2)) + 1.0
    dice = 2.0 * inter / denom
    return jnp.clip(jnp.mean(1.0 - dice), 0.0, 1.0)


if __name__ == "__main__":
    key = jax.random.PRNGKey(0)

    def run_case(B, H, W, max_tile_bytes=_DEFAULT_MAX_TILE_BYTES):
        k = jax.random.fold_in(key, B * 100000 + H * 100 + W)
        k1, k2 = jax.random.split(k)
        pred = jax.nn.sigmoid(jax.random.normal(k1, (B, 1, H, W), dtype=jnp.float32))
        target = (jax.random.uniform(k2, (B, H, W)) > 0.5).astype(jnp.float32)
        loss = jax.block_until_ready(
            dice_loss_2d(pred, target, max_tile_bytes=max_tile_bytes))
        ref = jax.block_until_ready(_reference(pred, target))
        assert np.allclose(np.asarray(loss), np.asarray(ref),
                           rtol=1e-4, atol=1e-6), ((B, H, W), loss, ref)

    # Primary case from the module contract: pred (2,1,16,16), target (2,16,16).
    run_case(2, 16, 16)
    # B=1: exercises the 2-way spatial core split + in-kernel tail masking
    # (tiny tile budget forces multiple spatial tiles on a small image).
    run_case(1, 50, 50, max_tile_bytes=16 * _LANES * 4)
    # Multi-step spatial accumulation on a pad-free (H*W % 1024 == 0) layout.
    run_case(2, 64, 64, max_tile_bytes=8 * _LANES * 4)

    print("KERNEL_OK")
</pallas_src>

<mosaic_0001>
module attributes {stable_mosaic.version = 11 : i64} {
  func.func @_dice_partial_kernel(%arg0: i32, %arg1: i32, %arg2: i32, %arg3: memref<1x8x128xf32, #tpu.memory_space<vmem>>, %arg4: memref<1x8x128xf32, #tpu.memory_space<vmem>>, %arg5: memref<1x1x8x128xf32, #tpu.memory_space<vmem>>, %arg6: memref<1x1x8x128xf32, #tpu.memory_space<vmem>>, %arg7: memref<2x8x128xf32, #tpu.memory_space<vmem>>) attributes {dimension_semantics = [#tpu.dimension_semantics<parallel>, #tpu.dimension_semantics<parallel>, #tpu.dimension_semantics<arbitrary>], iteration_bounds = array<i64: 1, 2, 1>, scalar_prefetch = 0 : i64, scratch_operands = 1 : i64, tpu.core_type = #tpu.core_type<tc>, window_params = [{transform_indices = @transform_0, window_bounds = array<i64: 1, 8, 128>}, {transform_indices = @transform_1, window_bounds = array<i64: 1, 8, 128>}, {transform_indices = @transform_2, window_bounds = array<i64: 1, 1, 8, 128>}, {transform_indices = @transform_3, window_bounds = array<i64: 1, 1, 8, 128>}]} {
    %c0_i32 = arith.constant 0 : i32
    %0 = arith.cmpi eq, %arg2, %c0_i32 : i32
    %1 = arith.extui %0 : i1 to i32
    %c0_i32_0 = arith.constant 0 : i32
    %2 = arith.cmpi ne, %1, %c0_i32_0 : i32
    scf.if %2 {
      %cst_20 = arith.constant 0.000000e+00 : f32
      %25 = vector.broadcast %cst_20 : f32 to vector<2x8x128xf32>
      %c0_21 = arith.constant 0 : index
      %c0_22 = arith.constant 0 : index
      %c0_23 = arith.constant 0 : index
      %26 = vector.load %arg7[%c0_21, %c0_22, %c0_23] : memref<2x8x128xf32, #tpu.memory_space<vmem>>, vector<2x8x128xf32>
      tpu.vector_store %arg7[%c0_21, %c0_22, %c0_23], %25 {strides = array<i32>} : memref<2x8x128xf32, #tpu.memory_space<vmem>>, vector<2x8x128xf32>,
    } else {
    }
    %c0 = arith.constant 0 : index
    %c0_1 = arith.constant 0 : index
    %c0_2 = arith.constant 0 : index
    %3 = vector.load %arg3[%c0, %c0_1, %c0_2] : memref<1x8x128xf32, #tpu.memory_space<vmem>>, vector<1x8x128xf32>
    %c0_3 = arith.constant 0 : index
    %c0_4 = arith.constant 0 : index
    %c0_5 = arith.constant 0 : index
    %4 = vector.load %arg4[%c0_3, %c0_4, %c0_5] : memref<1x8x128xf32, #tpu.memory_space<vmem>>, vector<1x8x128xf32>
    %5 = arith.mulf %3, %4 : vector<1x8x128xf32>
    %6 = arith.subf %3, %4 : vector<1x8x128xf32>
    %7 = arith.mulf %6, %6 : vector<1x8x128xf32>
    %c0_6 = arith.constant 0 : index
    %c0_7 = arith.constant 0 : index
    %c0_8 = arith.constant 0 : index
    %8 = vector.load %arg7[%c0_6, %c0_7, %c0_8] : memref<2x8x128xf32, #tpu.memory_space<vmem>>, vector<1x8x128xf32>
    %9 = vector.shape_cast %8 : vector<1x8x128xf32> to vector<8x128xf32>
    %cst = arith.constant dense<0.000000e+00> : vector<8x128xf32>
    %10 = vector.multi_reduction <add>, %5, %cst [0] : vector<1x8x128xf32> to vector<8x128xf32>
    %11 = arith.addf %9, %10 : vector<8x128xf32>
    %c0_9 = arith.constant 0 : index
    %c0_10 = arith.constant 0 : index
    %c0_11 = arith.constant 0 : index
    %12 = vector.load %arg7[%c0_9, %c0_10, %c0_11] : memref<2x8x128xf32, #tpu.memory_space<vmem>>, vector<1x8x128xf32>
    %13 = vector.shape_cast %12 : vector<1x8x128xf32> to vector<8x128xf32>
    %14 = vector.shape_cast %11 : vector<8x128xf32> to vector<1x8x128xf32>
    tpu.vector_store %arg7[%c0_9, %c0_10, %c0_11], %14 {strides = array<i32>} : memref<2x8x128xf32, #tpu.memory_space<vmem>>, vector<1x8x128xf32>,
    %c1 = arith.constant 1 : index
    %c0_12 = arith.constant 0 : index
    %c0_13 = arith.constant 0 : index
    %15 = vector.load %arg7[%c1, %c0_12, %c0_13] : memref<2x8x128xf32, #tpu.memory_space<vmem>>, vector<1x8x128xf32>
    %16 = vector.shape_cast %15 : vector<1x8x128xf32> to vector<8x128xf32>
    %cst_14 = arith.constant dense<0.000000e+00> : vector<8x128xf32>
    %17 = vector.multi_reduction <add>, %7, %cst_14 [0] : vector<1x8x128xf32> to vector<8x128xf32>
    %18 = arith.addf %16, %17 : vector<8x128xf32>
    %c1_15 = arith.constant 1 : index
    %c0_16 = arith.constant 0 : index
    %c0_17 = arith.constant 0 : index
    %19 = vector.load %arg7[%c1_15, %c0_16, %c0_17] : memref<2x8x128xf32, #tpu.memory_space<vmem>>, vector<1x8x128xf32>
    %20 = vector.shape_cast %19 : vector<1x8x128xf32> to vector<8x128xf32>
    %21 = vector.shape_cast %18 : vector<8x128xf32> to vector<1x8x128xf32>
    tpu.vector_store %arg7[%c1_15, %c0_16, %c0_17], %21 {strides = array<i32>} : memref<2x8x128xf32, #tpu.memory_space<vmem>>, vector<1x8x128xf32>,
    %c0_i32_18 = arith.constant 0 : i32
    %22 = arith.cmpi eq, %arg2, %c0_i32_18 : i32
    %23 = arith.extui %22 : i1 to i32
    %c0_i32_19 = arith.constant 0 : i32
    %24 = arith.cmpi ne, %23, %c0_i32_19 : i32
    scf.if %24 {
      %c0_20 = arith.constant 0 : index
      %c0_21 = arith.constant 0 : index
      %c0_22 = arith.constant 0 : index
      %25 = vector.load %arg7[%c0_20, %c0_21, %c0_22] : memref<2x8x128xf32, #tpu.memory_space<vmem>>, vector<1x8x128xf32>
      %26 = vector.shape_cast %25 : vector<1x8x128xf32> to vector<8x128xf32>
      %27 = vector.shape_cast %26 : vector<8x128xf32> to vector<1x8x128xf32>
      %cst_23 = arith.constant dense<0.000000e+00> : vector<1xf32>
      %28 = vector.multi_reduction <add>, %27, %cst_23 [1, 2] : vector<1x8x128xf32> to vector<1xf32>
      %29 = vector.shape_cast %28 : vector<1xf32> to vector<1x1x1xf32>
      %30 = vector.extract %29[0, 0, 0] : f32 from vector<1x1x1xf32>
      %c1_24 = arith.constant 1 : index
      %c0_25 = arith.constant 0 : index
      %c0_26 = arith.constant 0 : index
      %31 = vector.load %arg7[%c1_24, %c0_25, %c0_26] : memref<2x8x128xf32, #tpu.memory_space<vmem>>, vector<1x8x128xf32>
      %32 = vector.shape_cast %31 : vector<1x8x128xf32> to vector<8x128xf32>
      %33 = vector.shape_cast %32 : vector<8x128xf32> to vector<1x8x128xf32>
      %cst_27 = arith.constant dense<0.000000e+00> : vector<1xf32>
      %34 = vector.multi_reduction <add>, %33, %cst_27 [1, 2] : vector<1x8x128xf32> to vector<1xf32>
      %35 = vector.shape_cast %34 : vector<1xf32> to vector<1x1x1xf32>
      %36 = vector.extract %35[0, 0, 0] : f32 from vector<1x1x1xf32>
      %37 = vector.broadcast %30 : f32 to vector<1x1x8x128xf32>
      %c0_28 = arith.constant 0 : index
      %c0_29 = arith.constant 0 : index
      %c0_30 = arith.constant 0 : index
      %c0_31 = arith.constant 0 : index
      %38 = vector.load %arg5[%c0_28, %c0_29, %c0_30, %c0_31] : memref<1x1x8x128xf32, #tpu.memory_space<vmem>>, vector<1x1x8x128xf32>
      tpu.vector_store %arg5[%c0_28, %c0_29, %c0_30, %c0_31], %37 {strides = array<i32>} : memref<1x1x8x128xf32, #tpu.memory_space<vmem>>, vector<1x1x8x128xf32>,
      %39 = vector.broadcast %36 : f32 to vector<1x1x8x128xf32>
      %c0_32 = arith.constant 0 : index
      %c0_33 = arith.constant 0 : index
      %c0_34 = arith.constant 0 : index
      %c0_35 = arith.constant 0 : index
      %40 = vector.load %arg6[%c0_32, %c0_33, %c0_34, %c0_35] : memref<1x1x8x128xf32, #tpu.memory_space<vmem>>, vector<1x1x8x128xf32>
      tpu.vector_store %arg6[%c0_32, %c0_33, %c0_34, %c0_35], %39 {strides = array<i32>} : memref<1x1x8x128xf32, #tpu.memory_space<vmem>>, vector<1x1x8x128xf32>,
    } else {
    }
    return
  }
  func.func @transform_0(%arg0: i32, %arg1: i32, %arg2: i32) -> (i32, i32, i32) {
    %c1_i32 = arith.constant 1 : i32
    %0 = arith.muli %arg0, %c1_i32 : i32
    %1 = arith.addi %0, %arg2 : i32
    %c0_i32 = arith.constant 0 : i32
    %2 = arith.minsi %1, %c0_i32 : i32
    %c0_i32_0 = arith.constant 0 : i32
    %c0_i32_1 = arith.constant 0 : i32
    return %arg1, %2, %c0_i32_0 : i32, i32, i32
  }
  func.func @transform_1(%arg0: i32, %arg1: i32, %arg2: i32) -> (i32, i32, i32) {
    %c1_i32 = arith.constant 1 : i32
    %0 = arith.muli %arg0, %c1_i32 : i32
    %1 = arith.addi %0, %arg2 : i32
    %c0_i32 = arith.constant 0 : i32
    %2 = arith.minsi %1, %c0_i32 : i32
    %c0_i32_0 = arith.constant 0 : i32
    %c0_i32_1 = arith.constant 0 : i32
    return %arg1, %2, %c0_i32_0 : i32, i32, i32
  }
  func.func @transform_2(%arg0: i32, %arg1: i32, %arg2: i32) -> (i32, i32, i32, i32) {
    %c0_i32 = arith.constant 0 : i32
    %c0_i32_0 = arith.constant 0 : i32
    %c0_i32_1 = arith.constant 0 : i32
    return %arg0, %arg1, %c0_i32, %c0_i32_0 : i32, i32, i32, i32
  }
  func.func @transform_3(%arg0: i32, %arg1: i32, %arg2: i32) -> (i32, i32, i32, i32) {
    %c0_i32 = arith.constant 0 : i32
    %c0_i32_0 = arith.constant 0 : i32
    %c0_i32_1 = arith.constant 0 : i32
    return %arg0, %arg1, %c0_i32, %c0_i32_0 : i32, i32, i32, i32
  }
}

</mosaic_0001>

<bundles_post_ra>
// kernel: tpu_custom_call.1
= control target key start
LH: loop header
LB: loop body
LE: loop exit
PB: predicated region body
PF: predicated region fallthrough
CT: control target
= control target key end

     0   :  { %9 = vsyncpa [#allocation4], 0  ;;  %s1012_s0 = inlined_call_operand.hbm [shape: f32[2,8,128], index: 0, kind: input, shape index: {}]   ;;  %s1013_s1 = inlined_call_operand.hbm [shape: f32[2,8,128], index: 1, kind: input, shape index: {}]   ;;  %s1014_s2 = inlined_call_operand.hbm [shape: f32[1,2,8,128], index: 2, kind: output, shape index: {0}]   ;;  %s1015_s3 = inlined_call_operand.hbm [shape: f32[1,2,8,128], index: 3, kind: output, shape index: {1}]  }
   0x1   :  { %11 = vsyncpa [#allocation4 + $0x1], 0 }
   0x2   :  { %12 = vsyncpa [#allocation7], 0 }
   0x3   :  { %14 = vsyncpa [#allocation7 + $0x1], 0 }
   0x4   :  { %15 = vsyncpa [#allocation5], 0 }
   0x5   :  { %17 = vsyncpa [#allocation5 + $0x1], 0 }
   0x6   :  { %18 = vsyncpa [#allocation10], 0 }
   0x7   :  { %20 = vsyncpa [#allocation10 + $0x1], 0  ;;  %s803_s12 = smov 0   ;;  %s805_s13 = smov 0  }
   0x8   :  { %s807_s14 = smov 0   ;;  %s809_s15 = smov 0  }
   0x9   :  { %s811_s16 = smov 0   ;;  %s813_s17 = smov 0  }
   0xa LB: > { %s512_s18 = sadd.s32 4294967295, %s777_s17   ;;  %s513_s19 = sadd.s32 4294967294, %s777_s17   ;;  %s777_s17 = sphi %s813_s17, %s26_s17   ;;  %s773_s16 = sphi %s811_s16, %s1027_s16   ;;  %s769_s15 = sphi %s809_s15, %s1026_s15   ;;  %s765_s14 = sphi %s807_s14, %s1025_s14   ;;  %s761_s13 = sphi %s805_s13, %s1024_s13   ;;  %s757_s12 = sphi %s803_s12, %s1023_s12  }
   0xb   : > { %s41_s20 = sadd.s32 1, %s773_s16  ;;  %s60_s21 = sadd.s32 1, %s765_s14 }
   0xc   : > { %p43_p0 = scmp.ge.s32.totalorder %s41_s20, 2  ;;  %p67_p1 = scmp.ne.s32.totalorder %s765_s14, %s761_s13 }
   0xd   : > { %p68_p2 = scmp.eq.s32.totalorder %s777_s17, 0  ;;  %p73_p3 = scmp.ne.s32.totalorder %s761_s13, %s757_s12 }
   0xe   : > { %s1029_s20 = smov (%p43_p0, %s41_s20), 0  ;;  %p74_p5 = scmp.eq.s32.totalorder %s512_s18, 0 }
   0xf   : > { %p844_p4 = por %p68_p2, %p67_p1  ;;  %s55_s23 = ssub.s32 %s773_s16, %s1029_s20 }
  0x10   : > { %p133_p6 = scmp.eq.s32.totalorder %s512_s18, 1  ;;  %p58_p7 = scmp.eq.s32.totalorder %s55_s23, 0 }
  0x11   : > { %p850_p8 = por %p74_p5, %p73_p3  ;;  %p139_p10 = scmp.eq.s32.totalorder %s513_s19, 1 }
  0x12   : > { %p854_p9 = por %p133_p6, %p67_p1  ;;  %p557_p13 = scmp.lt.s32.totalorder %s777_s17, 2 }
  0x13   : > { %s859_s26 = scalar_select %p58_p7, %s765_s14, %s60_s21  }
  0x14   : > { %p861_p11 = por %p139_p10, %p73_p3  ;;  %s868_s28 = sand.u32 1, %s765_s14  }
  0x15   : > { %s516_s29 = sshll.u32 %s868_s28, 3  ;;  %s517_s30 = sshll.u32 %s773_s16, 7 }
  0x16   : > { %s200_s6 = scalar_lea.hbm %s1012_s0, %s517_s30  ;;  %s191_s7 = scalar_lea.vmem [#allocation3], %s516_s29 }
  0x17   : > { %s202_s8 = sshll.u32 %s191_s7, 4  ;;  %p877_p0 = pnand %p557_p13, %p844_p4  ;;  %s203_s8 = int_to_ptr.vmem [resolvable:$true] %s202_s8 }
  0x18   : > { %p520_p1 = scmp.ge.s32.totalorder %s777_s17, 1  ;;  %p229_p2 = scmp.lt.s32.totalorder %s777_s17, 3 }
  0x19   : > { %s188_s10 = scalar_lea.sflag [#allocation4], %s868_s28  ;;  %p609_p3 = pneg %p877_p0 }
  0x1a   : > { %s620_s11 = scalar_lea.vmem %s203_s8, 128  ;;  %s779_s18 = smov [#allocation3]  }
  0x1b   : > { %p621_p5 = scmp.ne.s32.totalorder %s203_s8, %s620_s11  ;;  %s625_s19 = sshll.u32 %s779_s18, 4  ;;  %s626_s19 = int_to_ptr.vmem [resolvable:$false] %s625_s19 }
  0x1c   : > { %s627_s21 = scalar_lea.vmem %s626_s19, 256  ;;  %p628_p4 = scmp.lt.s32.totalorder %s203_s8, %s626_s19 }
  0x1d   : > { %p623_p6 = pnand %p621_p5, %p609_p3  ;;  %p629_p10 = scmp.lt.s32.totalorder %s627_s21, %s620_s11 }
  0x1f   : > { %p624_p7 = pneg %p623_p6  ;;  %p630_p13 = por %p629_p10, %p628_p4 }
  0x21   : > { %p631_p12 = pnand %p630_p13, %p624_p7 }
  0x23   : > { %634 = shalt.err (!%p631_p12)
}
  0x24   : > { %546 = dma.hbm_to_vmem [thread:$0]  (!%p877_p0), %s200_s6, 128, %s203_s8, %s188_s10  }
  0x25   : > { %p895_p5 = pnand %p520_p1, %p229_p2  ;;  %s222_s5 = scalar_lea.hbm %s1013_s1, %s517_s30 }
  0x26   : > { %s213_s7 = scalar_lea.vmem [#allocation6], %s516_s29  ;;  %s210_s18 = scalar_lea.sflag [#allocation7], %s868_s28 }
  0x27   : > { %s224_s11 = sshll.u32 %s213_s7, 4  ;;  %s780_s6 = smov [#allocation6]   ;;  %s225_s11 = int_to_ptr.vmem [resolvable:$true] %s224_s11 }
  0x28   : > { %s648_s19 = scalar_lea.vmem %s225_s11, 128  ;;  %s653_s8 = sshll.u32 %s780_s6, 4  ;;  %s654_s8 = int_to_ptr.vmem [resolvable:$false] %s653_s8 }
  0x29   : > { %p649_p12 = scmp.ne.s32.totalorder %s225_s11, %s648_s19  ;;  %s655_s10 = scalar_lea.vmem %s654_s8, 256 }
  0x2a   : > { %p656_p1 = scmp.lt.s32.totalorder %s225_s11, %s654_s8  ;;  %p657_p2 = scmp.lt.s32.totalorder %s655_s10, %s648_s19 }
  0x2b   : > { %p651_p6 = pnand %p649_p12, %p609_p3 }
  0x2c   : > { %p658_p4 = por %p657_p2, %p656_p1 }
  0x2d   : > { %p652_p7 = pneg %p651_p6 }
  0x2f   : > { %p659_p10 = pnand %p658_p4, %p652_p7 }
  0x31   : > { %662 = shalt.err (!%p659_p10)
}
  0x32   : > { %549 = dma.hbm_to_vmem [thread:$0]  (!%p877_p0), %s222_s5, 128, %s225_s11, %s210_s18  }
  0x33   : > { %233 = sbr.rel (%p895_p5) target bundleno = 299 (0x12b), region = 28  ;;  %s911_s28 = sand.u32 (!%p895_p5), 1, %s761_s13  }
  0x34   : > { %s914_s29 = sshll.u32 (!%p895_p5), %s911_s28, 3  ;;  %s236_s30 = scalar_lea.sflag (!%p895_p5), [#allocation4], %s911_s28 }
  0x35   : > { %s239_s21 = scalar_lea.vmem (!%p895_p5), [#allocation3], %s914_s29 }
  0x38   : > { %740 = dma.done.wait (%p850_p8), %s236_s30, 128  }
  0x39   : > { %742 = vsyncadd (%p850_p8), %s236_s30, 4294967168  ;;  %s245_s9 = scalar_lea.sflag [#allocation7], %s911_s28  ;;  %s248_s22 = scalar_lea.vmem [#allocation6], %s914_s29 }
  0x3a   : > { %744 = dma.done.wait (%p850_p8), %s245_s9, 128  }
  0x3b   : > { %746 = vsyncadd (%p850_p8), %s245_s9, 4294967168  ;;  %v293_v0 = vld [vmem:[%s239_s21] sm:$0xff]  ;;  %v294_v1 = vld [vmem:[%s248_s22] sm:$0xff]  ;;  %s527_s24 = sshll.u32 %s769_s15, 7  ;;  %s273_s23 = scalar_lea.vmem [#allocation8], %s914_s29 }
  0x3c   : > { %v295_v2 = vmul.f32 %v294_v1, %v293_v0  ;;  %v296_v3 = vsub.f32 %v293_v0, %v294_v1  ;;  %s355_s4 = sshll.u32 %s273_s23, 4  ;;  %s280_s5 = scalar_lea.vmem [#allocation9], %s914_s29  ;;  %s940_s4 = int_to_ptr.vmem [resolvable:$true] %s355_s4 }
  0x3d   : > { %s370_s7 = sshll.u32 %s280_s5, 4  ;;  %s938_s19 = scalar_lea.hbm %s1014_s2, %s527_s24  ;;  %s942_s7 = int_to_ptr.vmem [resolvable:$true] %s370_s7 }
  0x3e   : > { %311 = vadd.xlane.f32.xlu0 %v295_v2  ;;  %v297_v4 = vmul.f32 %v296_v3, %v296_v3  ;;  %s335_s8 = scalar_lea.sflag [#allocation5], %s911_s28  ;;  %s663_s10 = scalar_lea.vmem %s940_s4, 128 }
  0x3f   : > { %p664_p8 = scmp.ne.s32.totalorder %s940_s4, %s663_s10  ;;  %s781_s30 = smov [#allocation8]  }
  0x40   : > { %s667_s21 = sshll.u32 %s781_s30, 4  ;;  %s668_s21 = int_to_ptr.vmem [resolvable:$false] %s667_s21 }
  0x41   : > { %p665_p0 = pnand %p664_p8, %p854_p9  ;;  %s669_s9 = scalar_lea.vmem %s668_s21, 256 }
  0x42   : > { %321 = vadd.xlane.f32.xlu0 %v297_v4  ;;  %p670_p13 = scmp.lt.s32.totalorder %s940_s4, %s668_s21  ;;  %p671_p5 = scmp.lt.s32.totalorder %s669_s9, %s663_s10 }
  0x43   : > { %p666_p3 = pneg %p665_p0 }
  0x44   : > { %p672_p12 = por %p671_p5, %p670_p13 }
  0x46   : > { %p673_p6 = pnand %p672_p12, %p666_p3 }
  0xc7   : > { %v312_v5 = vpop.xlane.xlu0 %311 }
  0xc8   : > { %v313_v6 = vrot.slane %v312_v5, 4 }
  0xca   : > { %v314_v7 = vadd.f32 %v313_v6, %v312_v5 }
  0xcb   : > { %v322_v8 = vpop.xlane.xlu0 %321 }
  0xcc   : > { %v315_v9 = vrot.slane %v314_v7, 2  ;;  %v323_v10 = vrot.slane %v322_v8, 4 }
  0xce   : > { %v324_v11 = vadd.f32 %v323_v10, %v322_v8  ;;  %v316_v12 = vadd.f32 %v315_v9, %v314_v7 }
  0xd0   : > { %v325_v13 = vrot.slane %v324_v11, 2  ;;  %v317_v14 = vrot.slane %v316_v12, 1 }
  0xd2   : > { %v326_v15 = vadd.f32 %v325_v13, %v324_v11  ;;  %v318_v16 = vadd.f32 %v317_v14, %v316_v12 }
  0xd4   : > { %531 = vpush %v318_v16  ;;  %v327_v17 = vrot.slane %v326_v15, 1 }
  0xd6   : > { %v328_v18 = vadd.f32 %v327_v17, %v326_v15 }
  0xd8   : > { %533 = vpush %v328_v18 }
 0x105   : > { %s532_s6 = spop %531 }
 0x106   : > { %v330_v19 = vstv %s532_s6 }
 0x107   : > { %331 = vst [vmem:[%s273_s23] sm:$0xff] %v330_v19 }
 0x108   : > { %676 = shalt.err (!%p673_p6)
}
 0x109   : > { %s677_s22 = scalar_lea.hbm %s938_s19, 128  ;;  %s681_s18 = scalar_lea.hbm %s1014_s2, 256 }
 0x10a   : > { %p678_p7 = scmp.ne.s32.totalorder %s938_s19, %s677_s22  ;;  %p682_p4 = scmp.lt.s32.totalorder %s938_s19, %s1014_s2 }
 0x10b   : > { %p683_p10 = scmp.lt.s32.totalorder %s681_s18, %s677_s22 }
 0x10c   : > { %p679_p1 = pnand %p678_p7, %p854_p9 }
 0x10d   : > { %p684_p8 = por %p683_p10, %p682_p4 }
 0x10e   : > { %p680_p2 = pneg %p679_p1 }
 0x110   : > { %p685_p0 = pnand %p684_p8, %p680_p2 }
 0x112   : > { %688 = shalt.err (!%p685_p0)
}
 0x113   : > { %539 = dma.vmem_to_hbm [thread:$0]  (%p854_p9), %s940_s4, 128, %s938_s19, %s335_s8  }
 0x114   : > { %s534_s10 = spop %533  ;;  %s368_s22 = scalar_lea.hbm %s1015_s3, %s527_s24 }
 0x115   : > { %v332_v20 = vstv %s534_s10  ;;  %s340_s23 = scalar_lea.sflag [#allocation10], %s911_s28  ;;  %s689_s11 = scalar_lea.vmem %s942_s7, 128 }
 0x116   : > { %333 = vst [vmem:[%s280_s5] sm:$0xff] %v332_v20  ;;  %p690_p3 = scmp.ne.s32.totalorder %s942_s7, %s689_s11  ;;  %s782_s18 = smov [#allocation9]  }
 0x117   : > { %s693_s6 = sshll.u32 %s782_s18, 4  ;;  %s694_s6 = int_to_ptr.vmem [resolvable:$false] %s693_s6 }
 0x118   : > { %p691_p13 = pnand %p690_p3, %p854_p9  ;;  %s695_s30 = scalar_lea.vmem %s694_s6, 256 }
 0x119   : > { %p696_p12 = scmp.lt.s32.totalorder %s942_s7, %s694_s6  ;;  %p697_p6 = scmp.lt.s32.totalorder %s695_s30, %s689_s11 }
 0x11a   : > { %p692_p5 = pneg %p691_p13 }
 0x11b   : > { %p698_p7 = por %p697_p6, %p696_p12 }
 0x11d   : > { %p699_p1 = pnand %p698_p7, %p692_p5 }
 0x11f   : > { %702 = shalt.err (!%p699_p1)
}
 0x120   : > { %s703_s15 = scalar_lea.hbm %s368_s22, 128  ;;  %s707_s24 = scalar_lea.hbm %s1015_s3, 256 }
 0x121   : > { %p704_p2 = scmp.ne.s32.totalorder %s368_s22, %s703_s15  ;;  %p708_p8 = scmp.lt.s32.totalorder %s368_s22, %s1015_s3 }
 0x122   : > { %p709_p0 = scmp.lt.s32.totalorder %s707_s24, %s703_s15 }
 0x123   : > { %p705_p4 = pnand %p704_p2, %p854_p9 }
 0x124   : > { %p710_p3 = por %p709_p0, %p708_p8 }
 0x125   : > { %p706_p10 = pneg %p705_p4 }
 0x127   : > { %p711_p13 = pnand %p710_p3, %p706_p10 }
 0x129   : > { %714 = shalt.err (!%p711_p13)
}
 0x12a   : > { %540 = dma.vmem_to_hbm [thread:$0]  (%p854_p9), %s942_s7, 128, %s368_s22, %s340_s23  }
 0x12b PF: > { %s382_s19 = sand.u32 1, %s757_s12   ;;  %p1022_p5 = scmp.ge.s32.totalorder %s777_s17, 2 }
 0x12c   : > { %s383_s8 = scalar_lea.sflag [#allocation5], %s382_s19 }
 0x12d   : > { %p551_p12 = pnand %p1022_p5, %p861_p11 }
 0x12f   : > { %p552_p6 = pneg %p551_p12 }
 0x131   : > { %748 = dma.done.wait (%p552_p6), %s383_s8, 128  }
 0x132   : > { %750 = vsyncadd (%p552_p6), %s383_s8, 4294967168  ;;  %s392_s10 = scalar_lea.sflag [#allocation10], %s382_s19 }
 0x133   : > { %752 = dma.done.wait (%p552_p6), %s392_s10, 128  }
 0x134   : > { %754 = vsyncadd (%p552_p6), %s392_s10, 4294967168  ;;  %s26_s17 = sadd.s32 1, %s777_s17   ;;  %s1023_s12 = smov %s761_s13 }
 0x135   : > { %p23_p7 = scmp.ge.s32.totalorder %s26_s17, 4   ;;  %s1024_s13 = smov %s765_s14 }
 0x136   : > { %s1025_s14 = smov %s859_s26  ;;  %s1026_s15 = smov %s773_s16 }
 0x137   : > { %s1027_s16 = smov %s1029_s20  ;;  %25 = sbr.rel (!%p23_p7) target bundleno = 10 (0xa), region = 112 }
 0x13c   :  { %397 = vsyncpa [#allocation4], 1 }
 0x13d   :  { %399 = vsyncpa [#allocation4 + $0x1], 1 }
 0x13e   :  { %400 = vsyncpa [#allocation7], 1 }
 0x13f   :  { %402 = vsyncpa [#allocation7 + $0x1], 1 }
 0x140   :  { %403 = vsyncpa [#allocation5], 1 }
 0x141   :  { %405 = vsyncpa [#allocation5 + $0x1], 1 }
 0x142   :  { %406 = vsyncpa [#allocation10], 1 }
 0x143   :  { %408 = vsyncpa [#allocation10 + $0x1], 1 }

</bundles_post_ra>
